<compile_context>
chip_gen: v5e
topology: v5e:2x2
jax: 0.10.0
libtpu: 0.0.40
codegen_flags: <defaults>
</compile_context>

<pallas_src>
import functools

import jax
import jax.numpy as jnp
from jax.experimental import pallas as pl
from jax.experimental.pallas import tpu as pltpu


def _pick_lane_tile(hw):
    """Largest lane tile that divides H*W, is a multiple of 128, and <= 2048."""
    best = 0
    t = 128
    while t <= min(hw, 2048):
        if hw % t == 0:
            best = t
        t += 128
    return best if best else hw


def _subnet3_respad_kernel(x_ref, sc_ref, mean_ref, var_ref, w_ref, b_ref,
                           out_ref, *, eps, pad, c_res):
    """One (C, T) lane tile of the fused BN-affine + pad-shortcut + ReLU.

    x_ref:   (C, T)      channel-major activation tile (lanes = spatial)
    sc_ref:  (c_res, T)  real (un-padded) shortcut channels for this tile
    mean/var/w/b refs:  (C, 1) per-channel vectors (resident across the grid)
    out_ref: (C, T)      one (n, hw-tile) slab of the (N, C, H*W) output
    """
    # bn_12 (+eps) and bn_13 (rsqrt) -> EUP; bn_11 / bn_2 folded into one affine.
    inv_std = jax.lax.rsqrt(var_ref[...] + eps)           # (C, 1)
    scale = inv_std * w_ref[...]                          # (C, 1)
    shift = b_ref[...] - mean_ref[...] * scale            # (C, 1)

    y = x_ref[...] * scale + shift                        # (C, T)

    # Channel zero-pad of the shortcut folded in via static row slices:
    # rows [pad, pad + c_res) get "+ shortcut"; the padded rows get affine only.
    if pad > 0:
        out_ref[:pad, :] = jnp.maximum(y[:pad, :], 0.0)
        out_ref[pad + c_res:, :] = jnp.maximum(y[pad + c_res:, :], 0.0)
    out_ref[pad:pad + c_res, :] = jnp.maximum(
        y[pad:pad + c_res, :] + sc_ref[...], 0.0)


def subnet3_respad_forward(input_, mean, bias_var, out2, weight, bias,
                           running_mean, running_var, *, batchsize, channels,
                           height, width, momentum=0.1, eps=1e-5):
    """Functional forward of SubNet_3_ResPad.

    input_:  f32[C, N*H*W]   channel-major activation (as fed to bn_11)
    mean, bias_var, weight, bias, running_mean, running_var: f32[C]
    out2:    f32[N, C - 2*(C//4), 2H, 2W]   residual input for the pad shortcut
    Returns (out[N, C, H, W], new_running_mean[C], new_running_var[C]).
    """
    C, N, H, W = channels, batchsize, height, width
    HW = H * W
    NHW = N * HW
    pad = C // 4
    c_res = C - 2 * pad
    assert input_.shape == (C, NHW)
    assert batchsize > 1, "unbiased-variance correction requires batchsize > 1"

    x = input_.astype(jnp.float32)

    # Shortcut: stride-2 spatial subsample only (the channel zero-pad is done
    # inside the kernel, so only the real channels hit HBM / VMEM).
    sc = out2[:, :, ::2, ::2].astype(jnp.float32).reshape(N, c_res, HW)

    mean2 = mean.astype(jnp.float32).reshape(C, 1)
    var2 = bias_var.astype(jnp.float32).reshape(C, 1)
    w2 = weight.astype(jnp.float32).reshape(C, 1)
    b2 = bias.astype(jnp.float32).reshape(C, 1)

    T = _pick_lane_tile(HW)
    hw_blocks = HW // T
    grid = (N, hw_blocks)

    # x stays 2-D channel-major (C, N*H*W); the (n, hw) tile is lane block
    # n*hw_blocks + hw.  Output is written directly in (N, C, H*W) layout.
    x_spec = pl.BlockSpec((C, T), lambda n, hw: (0, n * hw_blocks + hw))
    sc_spec = pl.BlockSpec((None, c_res, T), lambda n, hw: (n, 0, hw))
    ch_spec = pl.BlockSpec((C, 1), lambda n, hw: (0, 0))   # resident params
    out_spec = pl.BlockSpec((None, C, T), lambda n, hw: (n, 0, hw))

    cost = pl.CostEstimate(
        flops=int(4 * C * NHW + 2 * c_res * NHW),
        transcendentals=int(C * N * hw_blocks),
        bytes_accessed=int(4 * (2 * C * NHW + c_res * NHW)),
    )

    kernel = functools.partial(_subnet3_respad_kernel, eps=eps, pad=pad,
                               c_res=c_res)

    out = pl.pallas_call(
        kernel,
        out_shape=jax.ShapeDtypeStruct((N, C, HW), jnp.float32),
        grid=grid,
        in_specs=[x_spec, sc_spec, ch_spec, ch_spec, ch_spec, ch_spec],
        out_specs=out_spec,
        compiler_params=pltpu.CompilerParams(
            dimension_semantics=("parallel", "parallel")),
        cost_estimate=cost,
    )(x, sc, mean2, var2, w2, b2)

    out = out.reshape(N, C, H, W)   # free (row-major view)

    # Buffer EMAs (bn_11.running_mean, bn_12.running_var): tiny (C,) vectors,
    # plain jnp.  NOTE: the module (as written) uses `batchsize` for the
    # unbiased-variance correction, not N*H*W -- we match the module.
    bs = float(batchsize)
    new_rm = ((1.0 - momentum) * running_mean.astype(jnp.float32)
              + momentum * mean.astype(jnp.float32))
    unbias_var = bias_var.astype(jnp.float32) * (bs / (bs - 1.0))
    new_rv = ((1.0 - momentum) * running_var.astype(jnp.float32)
              + momentum * unbias_var)
    return out, new_rm, new_rv


if __name__ == "__main__":
    # Small ResNet20-ish ResPad transition: N=2, C=16 output channels,
    # H=W=16 (so H*W = 256, lane-dense), shortcut input has C/2=8 channels
    # at double spatial resolution.
    N, C, H, W = 2, 16, 16, 16
    HW = H * W
    NHW = N * HW
    momentum, eps = 0.1, 1e-5
    c_res = C - 2 * (C // 4)

    key = jax.random.PRNGKey(0)
    k1, k2, k3, k4, k5 = jax.random.split(key, 5)

    input_ = jax.random.normal(k1, (C, NHW), jnp.float32)
    mean = jax.random.normal(k2, (C,), jnp.float32)
    bias_var = jnp.abs(jax.random.normal(k3, (C,), jnp.float32)) + 0.1
    out2 = jax.random.normal(k4, (N, c_res, 2 * H, 2 * W), jnp.float32)
    weight = jax.random.uniform(k5, (C,), jnp.float32)      # init.uniform_
    bias = jnp.zeros((C,), jnp.float32)                      # init.zeros_
    running_mean = jnp.zeros((C,), jnp.float32)              # buffer init
    running_var = jnp.ones((C,), jnp.float32)                # buffer init

    out, new_rm, new_rv = subnet3_respad_forward(
        input_, mean, bias_var, out2, weight, bias, running_mean, running_var,
        batchsize=N, channels=C, height=H, width=W,
        momentum=momentum, eps=eps)
    jax.block_until_ready((out, new_rm, new_rv))

    # ---- reference: straight-line translation of the PyTorch forward ----
    bs = float(N)
    output1 = input_ - mean[:, None]                               # bn_11
    ref_rm = (1.0 - momentum) * running_mean + momentum * mean
    inv_std1 = bias_var + eps                                      # bn_12
    unbias_var = bias_var * bs / (bs - 1.0)
    ref_rv = (1.0 - momentum) * running_var + momentum * unbias_var
    inv_std2 = 1.0 / jnp.sqrt(inv_std1)                            # bn_13
    output2 = output1 * inv_std2[:, None]
    bn_out = output2 * weight[:, None] + bias[:, None]             # bn_2
    bn_out = bn_out.reshape(C, N, H, W).transpose(1, 0, 2, 3)
    pad_c = C // 4
    sc_full = jnp.pad(out2[:, :, ::2, ::2],
                      ((0, 0), (pad_c, pad_c), (0, 0), (0, 0)))
    ref_out = jnp.maximum(bn_out + sc_full, 0.0)                   # shortcut+relu

    assert out.shape == ref_out.shape == (N, C, H, W)
    assert jnp.allclose(out, ref_out, rtol=1e-5, atol=1e-5)
    assert jnp.allclose(new_rm, ref_rm, rtol=1e-6, atol=1e-6)
    assert jnp.allclose(new_rv, ref_rv, rtol=1e-6, atol=1e-6)

    print("KERNEL_OK")
</pallas_src>

<mosaic_0001>
module attributes {stable_mosaic.version = 11 : i64} {
  func.func @_subnet3_respad_kernel(%arg0: i32, %arg1: i32, %arg2: memref<16x256xf32, #tpu.memory_space<vmem>>, %arg3: memref<1x8x256xf32, #tpu.memory_space<vmem>>, %arg4: memref<16x1xf32, #tpu.memory_space<vmem>>, %arg5: memref<16x1xf32, #tpu.memory_space<vmem>>, %arg6: memref<16x1xf32, #tpu.memory_space<vmem>>, %arg7: memref<16x1xf32, #tpu.memory_space<vmem>>, %arg8: memref<1x16x256xf32, #tpu.memory_space<vmem>>) attributes {dimension_semantics = [#tpu.dimension_semantics<parallel>, #tpu.dimension_semantics<parallel>], iteration_bounds = array<i64: 2, 1>, scalar_prefetch = 0 : i64, scratch_operands = 0 : i64, tpu.core_type = #tpu.core_type<tc>, window_params = [{transform_indices = @transform_0, window_bounds = array<i64: 16, 256>}, {transform_indices = @transform_1, window_bounds = array<i64: 1, 8, 256>}, {pipeline_mode = #tpu.pipeline_mode<synchronous>, transform_indices = @transform_2, window_bounds = array<i64: 16, 1>}, {pipeline_mode = #tpu.pipeline_mode<synchronous>, transform_indices = @transform_3, window_bounds = array<i64: 16, 1>}, {pipeline_mode = #tpu.pipeline_mode<synchronous>, transform_indices = @transform_4, window_bounds = array<i64: 16, 1>}, {pipeline_mode = #tpu.pipeline_mode<synchronous>, transform_indices = @transform_5, window_bounds = array<i64: 16, 1>}, {transform_indices = @transform_6, window_bounds = array<i64: 1, 16, 256>}]} {
    %c0 = arith.constant 0 : index
    %c0_0 = arith.constant 0 : index
    %0 = vector.load %arg5[%c0, %c0_0] : memref<16x1xf32, #tpu.memory_space<vmem>>, vector<16x1xf32>
    %cst = arith.constant 9.99999974E-6 : f32
    %1 = vector.broadcast %cst : f32 to vector<16x1xf32>
    %2 = arith.addf %0, %1 : vector<16x1xf32>
    %3 = math.rsqrt %2 : vector<16x1xf32>
    %c0_1 = arith.constant 0 : index
    %c0_2 = arith.constant 0 : index
    %4 = vector.load %arg6[%c0_1, %c0_2] : memref<16x1xf32, #tpu.memory_space<vmem>>, vector<16x1xf32>
    %5 = arith.mulf %3, %4 : vector<16x1xf32>
    %c0_3 = arith.constant 0 : index
    %c0_4 = arith.constant 0 : index
    %6 = vector.load %arg7[%c0_3, %c0_4] : memref<16x1xf32, #tpu.memory_space<vmem>>, vector<16x1xf32>
    %c0_5 = arith.constant 0 : index
    %c0_6 = arith.constant 0 : index
    %7 = vector.load %arg4[%c0_5, %c0_6] : memref<16x1xf32, #tpu.memory_space<vmem>>, vector<16x1xf32>
    %8 = arith.mulf %7, %5 : vector<16x1xf32>
    %9 = arith.subf %6, %8 : vector<16x1xf32>
    %c0_7 = arith.constant 0 : index
    %c0_8 = arith.constant 0 : index
    %10 = vector.load %arg2[%c0_7, %c0_8] : memref<16x256xf32, #tpu.memory_space<vmem>>, vector<16x256xf32>
    %11 = vector.broadcast %5 : vector<16x1xf32> to vector<16x256xf32>
    %12 = arith.mulf %10, %11 : vector<16x256xf32>
    %13 = vector.broadcast %9 : vector<16x1xf32> to vector<16x256xf32>
    %14 = arith.addf %12, %13 : vector<16x256xf32>
    %15 = vector.extract_strided_slice %14 {offsets = [0, 0], sizes = [4, 256], strides = [1, 1]} : vector<16x256xf32> to vector<4x256xf32>
    %cst_9 = arith.constant 0.000000e+00 : f32
    %16 = vector.broadcast %cst_9 : f32 to vector<4x256xf32>
    %17 = arith.maximumf %15, %16 : vector<4x256xf32>
    %c0_10 = arith.constant 0 : index
    %c0_11 = arith.constant 0 : index
    %c0_12 = arith.constant 0 : index
    %18 = vector.load %arg8[%c0_10, %c0_11, %c0_12] : memref<1x16x256xf32, #tpu.memory_space<vmem>>, vector<1x4x256xf32>
    %19 = vector.shape_cast %18 : vector<1x4x256xf32> to vector<4x256xf32>
    %20 = vector.shape_cast %17 : vector<4x256xf32> to vector<1x4x256xf32>
    tpu.vector_store %arg8[%c0_10, %c0_11, %c0_12], %20 {strides = array<i32>} : memref<1x16x256xf32, #tpu.memory_space<vmem>>, vector<1x4x256xf32>,
    %21 = vector.extract_strided_slice %14 {offsets = [12, 0], sizes = [4, 256], strides = [1, 1]} : vector<16x256xf32> to vector<4x256xf32>
    %cst_13 = arith.constant 0.000000e+00 : f32
    %22 = vector.broadcast %cst_13 : f32 to vector<4x256xf32>
    %23 = arith.maximumf %21, %22 : vector<4x256xf32>
    %c0_14 = arith.constant 0 : index
    %c12 = arith.constant 12 : index
    %c0_15 = arith.constant 0 : index
    %24 = vector.load %arg8[%c0_14, %c12, %c0_15] : memref<1x16x256xf32, #tpu.memory_space<vmem>>, vector<1x4x256xf32>
    %25 = vector.shape_cast %24 : vector<1x4x256xf32> to vector<4x256xf32>
    %26 = vector.shape_cast %23 : vector<4x256xf32> to vector<1x4x256xf32>
    tpu.vector_store %arg8[%c0_14, %c12, %c0_15], %26 {strides = array<i32>} : memref<1x16x256xf32, #tpu.memory_space<vmem>>, vector<1x4x256xf32>,
    %27 = vector.extract_strided_slice %14 {offsets = [4, 0], sizes = [8, 256], strides = [1, 1]} : vector<16x256xf32> to vector<8x256xf32>
    %c0_16 = arith.constant 0 : index
    %c0_17 = arith.constant 0 : index
    %c0_18 = arith.constant 0 : index
    %28 = vector.load %arg3[%c0_16, %c0_17, %c0_18] : memref<1x8x256xf32, #tpu.memory_space<vmem>>, vector<1x8x256xf32>
    %29 = vector.shape_cast %28 : vector<1x8x256xf32> to vector<8x256xf32>
    %30 = arith.addf %27, %29 : vector<8x256xf32>
    %cst_19 = arith.constant 0.000000e+00 : f32
    %31 = vector.broadcast %cst_19 : f32 to vector<8x256xf32>
    %32 = arith.maximumf %30, %31 : vector<8x256xf32>
    %c0_20 = arith.constant 0 : index
    %c4 = arith.constant 4 : index
    %c0_21 = arith.constant 0 : index
    %33 = vector.load %arg8[%c0_20, %c4, %c0_21] : memref<1x16x256xf32, #tpu.memory_space<vmem>>, vector<1x8x256xf32>
    %34 = vector.shape_cast %33 : vector<1x8x256xf32> to vector<8x256xf32>
    %35 = vector.shape_cast %32 : vector<8x256xf32> to vector<1x8x256xf32>
    tpu.vector_store %arg8[%c0_20, %c4, %c0_21], %35 {strides = array<i32>} : memref<1x16x256xf32, #tpu.memory_space<vmem>>, vector<1x8x256xf32>,
    return
  }
  func.func @transform_0(%arg0: i32, %arg1: i32) -> (i32, i32) {
    %c1_i32 = arith.constant 1 : i32
    %0 = arith.muli %arg0, %c1_i32 : i32
    %1 = arith.addi %0, %arg1 : i32
    %c0_i32 = arith.constant 0 : i32
    %c0_i32_0 = arith.constant 0 : i32
    return %c0_i32, %1 : i32, i32
  }
  func.func @transform_1(%arg0: i32, %arg1: i32) -> (i32, i32, i32) {
    %c0_i32 = arith.constant 0 : i32
    %c0_i32_0 = arith.constant 0 : i32
    return %arg0, %c0_i32, %arg1 : i32, i32, i32
  }
  func.func @transform_2(%arg0: i32, %arg1: i32) -> (i32, i32) {
    %c0_i32 = arith.constant 0 : i32
    %c0_i32_0 = arith.constant 0 : i32
    %c0_i32_1 = arith.constant 0 : i32
    return %c0_i32, %c0_i32_0 : i32, i32
  }
  func.func @transform_3(%arg0: i32, %arg1: i32) -> (i32, i32) {
    %c0_i32 = arith.constant 0 : i32
    %c0_i32_0 = arith.constant 0 : i32
    %c0_i32_1 = arith.constant 0 : i32
    return %c0_i32, %c0_i32_0 : i32, i32
  }
  func.func @transform_4(%arg0: i32, %arg1: i32) -> (i32, i32) {
    %c0_i32 = arith.constant 0 : i32
    %c0_i32_0 = arith.constant 0 : i32
    %c0_i32_1 = arith.constant 0 : i32
    return %c0_i32, %c0_i32_0 : i32, i32
  }
  func.func @transform_5(%arg0: i32, %arg1: i32) -> (i32, i32) {
    %c0_i32 = arith.constant 0 : i32
    %c0_i32_0 = arith.constant 0 : i32
    %c0_i32_1 = arith.constant 0 : i32
    return %c0_i32, %c0_i32_0 : i32, i32
  }
  func.func @transform_6(%arg0: i32, %arg1: i32) -> (i32, i32, i32) {
    %c0_i32 = arith.constant 0 : i32
    %c0_i32_0 = arith.constant 0 : i32
    return %arg0, %c0_i32, %arg1 : i32, i32, i32
  }
}

</mosaic_0001>

<bundles_post_ra>
// kernel: tpu_custom_call.1
= control target key start
LH: loop header
LB: loop body
LE: loop exit
PB: predicated region body
PF: predicated region fallthrough
CT: control target
= control target key end

     0   :  { %11 = vsyncpa [#allocation4], 0  ;;  %s966_s0 = inlined_call_operand.vmem [shape: f32[16,512], index: 0, kind: input, shape index: {}]   ;;  %s967_s1 = inlined_call_operand.hbm [shape: f32[2,8,256], index: 1, kind: input, shape index: {}]   ;;  %s968_s2 = inlined_call_operand.vmem [shape: f32[16,1], index: 2, kind: input, shape index: {}]   ;;  %s969_s3 = inlined_call_operand.vmem [shape: f32[16,1], index: 3, kind: input, shape index: {}]   ;;  %s970_s4 = inlined_call_operand.vmem [shape: f32[16,1], index: 4, kind: input, shape index: {}]   ;;  %s971_s5 = inlined_call_operand.vmem [shape: f32[16,1], index: 5, kind: input, shape index: {}]   ;;  %s972_s6 = inlined_call_operand.hbm [shape: f32[2,16,256], index: 6, kind: output, shape index: {}]  }
   0x1   :  { %13 = vsyncpa [#allocation4 + $0x1], 0 }
   0x2   :  { %14 = vsyncpa [#allocation5], 0 }
   0x3   :  { %16 = vsyncpa [#allocation5 + $0x1], 0  ;;  %s799_s21 = smov 0   ;;  %s801_s22 = smov 0  }
   0x4   :  { %s803_s23 = smov 0   ;;  %s805_s24 = smov 0  }
   0x5   :  { %s807_s25 = smov 0   ;;  %s809_s26 = smov 0  }
   0x6 LB: > { %s561_s27 = sadd.s32 4294967295, %s759_s26   ;;  %s562_s28 = sadd.s32 4294967294, %s759_s26   ;;  %s759_s26 = sphi %s809_s26, %s22_s26   ;;  %s755_s25 = sphi %s807_s25, %s981_s25   ;;  %s751_s24 = sphi %s805_s24, %s980_s24   ;;  %s747_s23 = sphi %s803_s23, %s979_s23   ;;  %s743_s22 = sphi %s801_s22, %s978_s22   ;;  %s739_s21 = sphi %s799_s21, %s977_s21  }
   0x7   : > { %s34_s29 = sadd.s32 1, %s755_s25  ;;  %s43_s30 = sadd.s32 1, %s747_s23 }
   0x8   : > { %p36_p0 = scmp.ge.s32.totalorder %s34_s29, 2  ;;  %p50_p1 = scmp.ne.s32.totalorder %s747_s23, %s743_s22 }
   0x9   : > { %p51_p2 = scmp.eq.s32.totalorder %s759_s26, 0  ;;  %p84_p3 = scmp.ne.s32.totalorder %s743_s22, %s739_s21 }
   0xa   : > { %s983_s29 = smov (%p36_p0, %s34_s29), 0  ;;  %p85_p5 = scmp.eq.s32.totalorder %s561_s27, 0 }
   0xb   : > { %p840_p4 = por %p51_p2, %p50_p1  ;;  %s40_s8 = ssub.s32 %s755_s25, %s983_s29 }
   0xc   : > { %p194_p6 = scmp.eq.s32.totalorder %s561_s27, 1  ;;  %p41_p7 = scmp.eq.s32.totalorder %s40_s8, 0 }
   0xd   : > { %p846_p8 = por %p85_p5, %p84_p3  ;;  %p200_p10 = scmp.eq.s32.totalorder %s562_s28, 1 }
   0xe   : > { %p850_p9 = por %p194_p6, %p50_p1  ;;  %p564_p12 = scmp.ge.s32.totalorder %s759_s26, 2 }
   0xf   : > { %s855_s11 = scalar_select %p41_p7, %s747_s23, %s43_s30  }
  0x10   : > { %p857_p11 = por %p200_p10, %p84_p3  ;;  %228 = sbr.rel (%p564_p12) target bundleno = 34 (0x22), region = 32 }
  0x15   : > { %231 = sbr.rel (!%p840_p4) target bundleno = 29 (0x1d), region = 36  ;;  %s233_s13 = sand.u32 (%p840_p4), 1, %s747_s23  }
  0x16   : > { %s580_s14 = sshll.u32 (%p840_p4), %s755_s25, 4  ;;  %s565_s15 = sshll.u32 (%p840_p4), %s233_s13, 5 }
  0x17   : > { %s239_s18 = scalar_lea.vmem (%p840_p4), %s966_s0, %s580_s14  ;;  %s235_s19 = scalar_lea.vmem (%p840_p4), [#allocation2], %s565_s15 }
  0x18   : > { %v252_v0 = vld [vmem:[%s239_s18] sm:$0xff] (%p840_p4)  ;;  %v254_v1 = vld [vmem:[%s239_s18 + $0x8] sm:$0xff] (%p840_p4) }
  0x19   : > { %v256_v2 = vld [vmem:[%s239_s18 + $0x20] sm:$0xff] (%p840_p4)  ;;  %253 = vst [vmem:[%s235_s19] sm:$0xff] (%p840_p4), %v252_v0  ;;  %v258_v3 = vld [vmem:[%s239_s18 + $0x28] sm:$0xff] (%p840_p4) }
  0x1a   : > { %255 = vst [vmem:[%s235_s19 + $0x8] sm:$0xff] %v254_v1 }
  0x1b   : > { %257 = vst [vmem:[%s235_s19 + $0x10] sm:$0xff] %v256_v2 }
  0x1c   : > { %259 = vst [vmem:[%s235_s19 + $0x18] sm:$0xff] %v258_v3 }
  0x1d PF: > { %s266_s20 = sand.u32 1, %s747_s23   ;;  %s581_s27 = sshll.u32 %s755_s25, 4 }
  0x1e   : > { %s568_s28 = sshll.u32 %s266_s20, 4  ;;  %s277_s13 = scalar_lea.hbm %s967_s1, %s581_s27 }
  0x1f   : > { %s279_s14 = sshll.u32 %s277_s13, 4  ;;  %s270_s16 = scalar_lea.vmem [#allocation3], %s568_s28  ;;  %s280_s14 = int_to_ptr.hbm [resolvable:$true] %s279_s14 }
  0x20   : > { %s281_s17 = sshll.u32 %s270_s16, 4  ;;  %s267_s15 = scalar_lea.sflag [#allocation4], %s266_s20  ;;  %s282_s17 = int_to_ptr.vmem [resolvable:$true] %s281_s17 }
  0x21   : > { %583 = dma.hbm_to_vmem [thread:$0]  (%p840_p4), %s280_s14, 256, %s282_s17, %s267_s15  }
  0x22 PF: > { %p571_p13 = scmp.ge.s32.totalorder %s759_s26, 1  ;;  %p286_p0 = scmp.lt.s32.totalorder %s759_s26, 3 }
  0x24   : > { %p287_p1 = pnand %p571_p13, %p286_p0 }
  0x25   : > { %s881_s18 = sand.u32 (!%p287_p1), 1, %s743_s22  }
  0x26   : > { %290 = sbr.rel (%p287_p1) target bundleno = 205 (0xcd), region = 63  ;;  %s572_s19 = sshll.u32 (!%p287_p1), %s881_s18, 5 }
  0x27   : > { %s573_s27 = sshll.u32 (!%p287_p1), %s881_s18, 4  ;;  %s887_s7 = scalar_lea.vmem (!%p287_p1), [#allocation2], %s572_s19 }
  0x28   : > { %s300_s20 = scalar_lea.sflag (!%p287_p1), [#allocation4], %s881_s18  ;;  %s890_s28 = scalar_lea.vmem (!%p287_p1), [#allocation3], %s573_s27 }
  0x2b   : > { %730 = dma.done.wait (%p846_p8), %s300_s20, 256  }
  0x2c   : > { %732 = vsyncadd (%p846_p8), %s300_s20, 4294967040  ;;  %v761_v4 = vmov 0   ;;  %v341_v5 = vld [vmem:[%s969_s3] sm:$0xff]  ;;  %v342_v7 = vld [vmem:[%s969_s3 + $0x8] sm:$0xff]  ;;  %s582_s17 = sshll.u32 %s751_s24, 5  ;;  %s336_s15 = scalar_lea.vmem [#allocation6], %s572_s19 }
  0x2d   : > { %643 = vset.pattern.permute.xlu0 %v761_v4  ;;  %644 = vset.pattern.permute.xlu1 %v761_v4  ;;  %v343_v6 = vadd.f32 1e-05, %v341_v5  ;;  %v344_v8 = vadd.f32 1e-05, %v342_v7  ;;  %v365_v20 = vld [vmem:[%s970_s4] sm:$0xff]  ;;  %v366_v24 = vld [vmem:[%s970_s4 + $0x8] sm:$0xff]  ;;  %s451_s20 = scalar_lea.hbm %s972_s6, %s582_s17 }
  0x2e   : > { %v371_v23 = vld [vmem:[%s968_s2] sm:$0xff]  ;;  %v372_v30 = vld [vmem:[%s968_s2 + $0x8] sm:$0xff]  ;;  %v379_v51 = vld [vmem:[%s887_s7 + $0x10] sm:$0xff]  ;;  %s454_s24 = sshll.u32 %s451_s20, 4  ;;  %s438_s19 = scalar_lea.sflag [#allocation5], %s881_s18  ;;  %s455_s24 = int_to_ptr.hbm [resolvable:$true] %s454_s24 }
  0x2f   : > { %645 = vrsqrt.f32 %v343_v6  ;;  %vm351_vm0 = vweird.f32 %v343_v6  ;;  %vm361_vm2 = vweird.f32 %v344_v8  ;;  %v369_v27 = vld [vmem:[%s971_s5] sm:$0xff]  ;;  %v370_v33 = vld [vmem:[%s971_s5 + $0x8] sm:$0xff]  ;;  %v380_v52 = vld [vmem:[%s887_s7 + $0x18] sm:$0xff]  ;;  %s691_s30 = sshra.s32 %s455_s24, 4  ;;  %s697_s9 = scalar_lea.hbm %s972_s6, 64  ;;  %s692_s30 = int_to_ptr.hbm [resolvable:$true] %s691_s30 }
  0x30   : > { %647 = vrsqrt.f32 %v344_v8  ;;  %v377_v35 = vld [vmem:[%s887_s7] sm:$0xff]  ;;  %v378_v36 = vld [vmem:[%s887_s7 + $0x8] sm:$0xff]  ;;  %s452_s7 = sshll.u32 %s336_s15, 4  ;;  %s693_s8 = scalar_lea.hbm %s692_s30, 32  ;;  %s453_s7 = int_to_ptr.vmem [resolvable:$true] %s452_s7 }
  0x31   : > { %v417_v38 = vld [vmem:[%s890_s28] sm:$0xff]  ;;  %v418_v39 = vld [vmem:[%s890_s28 + $0x8] sm:$0xff]  ;;  %p694_p2 = scmp.ne.s32.totalorder %s692_s30, %s693_s8  ;;  %p698_p5 = scmp.lt.s32.totalorder %s692_s30, %s972_s6 }
  0x32   : > { %v421_v42 = vrot.slane %v417_v38, 4  ;;  %v422_v43 = vrot.slane %v418_v39, 4  ;;  %p699_p6 = scmp.lt.s32.totalorder %s697_s9, %s693_s8 }
  0x33   : > { %p695_p3 = pnand %p694_p2, %p850_p9 }
  0x34   : > { %p700_p7 = por %p699_p6, %p698_p5 }
  0x35   : > { %v646_v9 = vpop.eup %645  ;;  %p696_p4 = pneg %p695_p3 }
  0x36   : > { %v648_v10 = vpop.eup %647  ;;  %v346_v11 = vmul.f32 %v646_v9, %v343_v6  ;;  %vm352_vm1 = vweird.f32 %v646_v9 }
  0x37   : > { %v356_v12 = vmul.f32 %v648_v10, %v344_v8  ;;  %vm362_vm3 = vweird.f32 %v648_v10  ;;  %vm353_vm4 = vmor %vm351_vm0, %vm352_vm1  ;;  %p701_p8 = pnand %p700_p7, %p696_p4 }
  0x38   : > { %v347_v13 = vmul.f32 %v646_v9, %v346_v11  ;;  %vm363_vm5 = vmor %vm361_vm2, %vm362_vm3 }
  0x39   : > { %v357_v14 = vmul.f32 %v648_v10, %v356_v12 }
  0x3a   : > { %v348_v15 = vmul.f32 0.5, %v347_v13 }
  0x3b   : > { %v358_v16 = vmul.f32 0.5, %v357_v14 }
  0x3c   : > { %v349_v17 = vsub.f32 1.5, %v348_v15 }
  0x3d   : > { %v359_v18 = vsub.f32 1.5, %v358_v16 }
  0x3e   : > { %v350_v19 = vmul.f32 %v646_v9, %v349_v17 }
  0x3f   : > { %v360_v21 = vmul.f32 %v648_v10, %v359_v18 }
  0x40   : > { %v354_v22 = vsel %vm353_vm4, %v646_v9, %v350_v19 }
  0x41   : > { %v367_v25 = vmul.f32 %v365_v20, %v354_v22  ;;  %v364_v26 = vsel %vm363_vm5, %v648_v10, %v360_v21 }
  0x42   : > { %v368_v29 = vmul.f32 %v366_v24, %v364_v26 }
  0x43   : > { %383 = vperm.xlu0 %643, %v367_v25   ;;  %v373_v28 = vmul.f32 %v371_v23, %v367_v25 }
  0x44   : > { %v374_v32 = vmul.f32 %v372_v30, %v368_v29 }
  0x45   : > { %v375_v31 = vsub.f32 %v369_v27, %v373_v28 }
  0x46   : > { %v376_v34 = vsub.f32 %v370_v33, %v374_v32 }
  0x47   : > { %397 = vperm.xlu1 %644, %v375_v31  }
  0x4b   : > { %388 = vperm.xlu0 %643, %v368_v29  }
  0x4f   : > { %402 = vperm.xlu1 %644, %v376_v34  }
  0xb5   : > { %v384_v37 = vpop.permute.xlu0 %383 }
  0xb6   : > { %v391_v40 = vmul.f32 %v384_v37, %v377_v35  ;;  %v392_v41 = vmul.f32 %v384_v37, %v378_v36 }
  0xb9   : > { %v398_v44 = vpop.permute.xlu1 %397 }
  0xba   : > { %v405_v45 = vadd.f32 %v398_v44, %v391_v40  ;;  %v406_v46 = vadd.f32 %v398_v44, %v392_v41 }
  0xbc   : > { %v409_v47 = vmax.f32 %v405_v45, 0.0  ;;  %v410_v48 = vmax.f32 %v406_v46, 0.0  ;;  %v425_v49 = vadd.f32 %v421_v42, %v405_v45  ;;  %v426_v50 = vadd.f32 %v422_v43, %v406_v46 }
  0xbd   : > { %v389_v53 = vpop.permute.xlu0 %388 }
  0xbe   : > { %411 = vst [vmem:[%s336_s15] sm:$0xf] %v409_v47  ;;  %v429_v54 = vmax.f32 %v425_v49, 0.0  ;;  %v430_v55 = vmax.f32 %v426_v50, 0.0  ;;  %v393_v56 = vmul.f32 %v389_v53, %v379_v51  ;;  %v394_v57 = vmul.f32 %v389_v53, %v380_v52 }
  0xbf   : > { %412 = vst [vmem:[%s336_s15 + $0x8] sm:$0xf] %v410_v48 }
  0xc0   : > { %433 = vst [vmem:[%s336_s15] sm:$0xf0] %v429_v54 }
  0xc1   : > { %434 = vst [vmem:[%s336_s15 + $0x8] sm:$0xf0] %v430_v55  ;;  %v403_v58 = vpop.permute.xlu1 %402 }
  0xc2   : > { %v407_v59 = vadd.f32 %v403_v58, %v393_v56  ;;  %v408_v60 = vadd.f32 %v403_v58, %v394_v57 }
  0xc4   : > { %v413_v61 = vmax.f32 %v407_v59, 0.0  ;;  %v414_v62 = vmax.f32 %v408_v60, 0.0  ;;  %v427_v63 = vadd.f32 %v421_v42, %v407_v59  ;;  %v428_v0 = vadd.f32 %v422_v43, %v408_v60 }
  0xc6   : > { %415 = vst [vmem:[%s336_s15 + $0x10] sm:$0xf0] %v413_v61  ;;  %v431_v1 = vmax.f32 %v427_v63, 0.0  ;;  %v432_v2 = vmax.f32 %v428_v0, 0.0 }
  0xc7   : > { %416 = vst [vmem:[%s336_s15 + $0x18] sm:$0xf0] %v414_v62 }
  0xc8   : > { %435 = vst [vmem:[%s336_s15 + $0x10] sm:$0xf] %v431_v1 }
  0xc9   : > { %436 = vst [vmem:[%s336_s15 + $0x18] sm:$0xf] %v432_v2 }
  0xca   : > { %704 = shalt.err (!%p701_p8)
}
  0xcb   : > { %s762_s18 = smov 256   ;;  %s763_s15 = smov 16  }
  0xcc   : > { %585 = dma.vmem_to_hbm [thread:$0]  (%p850_p9), %s453_s7, 512, %s455_s24, %s438_s19, %s762_s18, %s762_s18, %s763_s15  }
  0xcd PF: > { %s469_s28 = sand.u32 1, %s739_s21   ;;  %p588_p10 = pnand %p564_p12, %p857_p11 }
  0xce   : > { %s470_s27 = scalar_lea.sflag [#allocation5], %s469_s28 }
  0xcf   : > { %p589_p13 = pneg %p588_p10 }
  0xd1   : > { %734 = dma.done.wait (%p589_p13), %s470_s27, 512  }
  0xd2   : > { %736 = vsyncadd (%p589_p13), %s470_s27, 4294966784  ;;  %s22_s26 = sadd.s32 1, %s759_s26   ;;  %s977_s21 = smov %s743_s22 }
  0xd3   : > { %p19_p0 = scmp.ge.s32.totalorder %s22_s26, 4   ;;  %s978_s22 = smov %s747_s23 }
  0xd4   : > { %s979_s23 = smov %s855_s11  ;;  %s980_s24 = smov %s755_s25 }
  0xd5   : > { %s981_s25 = smov %s983_s29  ;;  %21 = sbr.rel (!%p19_p0) target bundleno = 6 (0x6), region = 120 }
  0xda   :  { %476 = vsyncpa [#allocation4], 1 }
  0xdb   :  { %478 = vsyncpa [#allocation4 + $0x1], 1 }
  0xdc   :  { %479 = vsyncpa [#allocation5], 1 }
  0xdd   :  { %481 = vsyncpa [#allocation5 + $0x1], 1 }

</bundles_post_ra>
